<compile_context>
chip_gen: v7x
topology: tpu7x:2x2x1
jax: 0.10.0
libtpu: 0.0.40
codegen_flags: <defaults>
</compile_context>

<pallas_src>
import functools

import jax
import jax.numpy as jnp
from jax.experimental import pallas as pl
from jax.experimental.pallas import tpu as pltpu


# ----------------------------------------------------------------------------
# Fused forward kernel (one batch element per grid step, everything in VMEM).
# ----------------------------------------------------------------------------
def _fdgt_kernel(x_ref, w_ref, l_ref, b_ref, o_ref, *,
                 hist_cols, n_cheb, cheb_cols, glu_halves, c_dec,
                 future_guided, w_offs, b_offs):
    f32, bf16 = jnp.float32, jnp.bfloat16

    def weight(i):                                # static slice of the packed
        r0, nr, nc = w_offs[i]                    # bf16 weight slab (16-row-
        return w_ref[r0:r0 + nr, 0:nc]            # aligned offsets -> no copy)

    def bias(i):
        o0, n = b_offs[i]
        return b_ref[0:1, o0:o0 + n]              # (1, n) f32 row

    def glu(h, seg, half):
        # Whole gated temporal conv layer = ONE matmul: taps folded into the
        # contraction dim, [value | gate] halves concatenated along outputs.
        y = jnp.dot(h.astype(bf16), weight(seg),
                    preferred_element_type=f32) + bias(seg)
        return y[:, :half] * jax.nn.sigmoid(y[:, half:])

    x = x_ref[0]                                  # (V, n_frames*C) bf16 slab

    # ---------------- Encoder ----------------
    h = glu(x[:, :hist_cols], 0, glu_halves[0])   # temporal GLU conv 1

    # Chebyshev graph conv: channel-mix first (c2 <= c1), then the lane-dense
    # V-contracted propagation with the small (Ks, V, V) basis kept in f32.
    hw = jnp.dot(h.astype(bf16), weight(1), preferred_element_type=f32)
    acc = jnp.dot(l_ref[0], hw[:, :cheb_cols], preferred_element_type=f32)
    for k in range(1, n_cheb):                    # static unroll over orders
        acc = acc + jnp.dot(l_ref[k],
                            hw[:, k * cheb_cols:(k + 1) * cheb_cols],
                            preferred_element_type=f32)
    h = jnp.maximum(acc + bias(1), 0.0)           # (V, T1*c2)

    h = glu(h, 2, glu_halves[1])                  # temporal GLU conv 2
    h = glu(h, 3, glu_halves[2])                  # temporal GLU conv 3

    # ---------------- Decoder ----------------
    d = glu(h, 4, glu_halves[3])                  # collapse Ko steps -> (V, c_dec)
    wfc = weight(5)                               # (c_dec [+ C], c_out)
    out = jnp.dot(d.astype(bf16), wfc[:c_dec, :], preferred_element_type=f32)
    if future_guided:                             # future-guided 1x1 FC term
        out = out + jnp.dot(x[:, hist_cols:], wfc[c_dec:, :],
                            preferred_element_type=f32)
    o_ref[...] = (out + bias(5))[None]


# ----------------------------------------------------------------------------
# One-time parameter preparation: banded weights, bf16 casts, slab packing.
# ----------------------------------------------------------------------------
def _banded_glu_weight(Wp, Wq, bp, bq, T_in):
    """Fold taps + GLU halves into one (T_in*Cin, 2*T_out*Cout) matmul weight."""
    taps, Cin, Cout = Wp.shape
    T_out = T_in - taps + 1
    W = jnp.zeros((T_in * Cin, 2 * T_out * Cout), jnp.float32)
    for t in range(T_out):
        for k in range(taps):
            r = (t + k) * Cin
            W = W.at[r:r + Cin, t * Cout:(t + 1) * Cout].set(Wp[k])
            W = W.at[r:r + Cin,
                     T_out * Cout + t * Cout:T_out * Cout + (t + 1) * Cout].set(Wq[k])
    b = jnp.concatenate([jnp.tile(bp, (1, T_out)), jnp.tile(bq, (1, T_out))], axis=1)
    return W, b


def _cheb_mix_weight(Wgc, bgc, T1):
    """All Ks channel-mix weights side by side: (T1*c1, Ks*T1*c2)."""
    Ks = Wgc.shape[0]
    eye = jnp.eye(T1, dtype=jnp.float32)
    W = jnp.concatenate([jnp.kron(eye, Wgc[k]) for k in range(Ks)], axis=1)
    b = jnp.tile(bgc, (1, T1))
    return W, b


def _pack_weight_slab(mats):
    """Concatenate all weight matrices into one bf16 slab (16-aligned rows)."""
    width = max(int(m.shape[1]) for m in mats)
    width = ((width + 127) // 128) * 128
    rows = [((int(m.shape[0]) + 15) // 16) * 16 for m in mats]
    slab = jnp.zeros((sum(rows), width), jnp.bfloat16)
    offs, r = [], 0
    for m, nr in zip(mats, rows):
        slab = slab.at[r:r + m.shape[0], :m.shape[1]].set(m.astype(jnp.bfloat16))
        offs.append((r, int(m.shape[0]), int(m.shape[1])))
        r += nr
    return slab, tuple(offs)


def _pack_bias_slab(rows):
    slab = jnp.concatenate(rows, axis=1).astype(jnp.float32)    # (1, total)
    offs, o = [], 0
    for r in rows:
        offs.append((o, int(r.shape[1])))
        o += int(r.shape[1])
    return slab, tuple(offs)


def prepare_fdgt(params, Lk, *, T, C, Kt, Ks, Ko, blocks, future_guided):
    c1, c2, c3 = blocks[1]
    c_dec, c_out = blocks[2][0], blocks[3][0]
    T1, T2 = T - (Kt - 1), T - 2 * (Kt - 1)
    assert Ko == T - 3 * (Kt - 1)

    w1, b1 = _banded_glu_weight(params["Wp_t1"], params["Wq_t1"],
                                params["bp_t1"], params["bq_t1"], T)
    wm, bm = _cheb_mix_weight(params["W_gc"], params["b_gc"], T1)
    w2, b2 = _banded_glu_weight(params["Wp_t2"], params["Wq_t2"],
                                params["bp_t2"], params["bq_t2"], T1)
    w3, b3 = _banded_glu_weight(params["Wp_t3"], params["Wq_t3"],
                                params["bp_t3"], params["bq_t3"], T2)
    wd, bd = _banded_glu_weight(params["Wp_dec"], params["Wq_dec"],
                                params["bp_dec"], params["bq_dec"], Ko)
    wfc = (jnp.concatenate([params["W_fc_h"], params["W_fc_f"]], axis=0)
           if future_guided else params["W_fc_h"])

    w_slab, w_offs = _pack_weight_slab([w1, wm, w2, w3, wd, wfc])
    b_slab, b_offs = _pack_bias_slab([b1, bm, b2, b3, bd, params["b_fc"]])

    return dict(
        w_slab=w_slab, b_slab=b_slab, lk=Lk.astype(jnp.float32),
        w_offs=w_offs, b_offs=b_offs,
        T=T, C=C, Ks=Ks, V=int(Lk.shape[-1]),
        hist_cols=T * C, cheb_cols=T1 * c2,
        glu_halves=(T1 * c1, T2 * c3, Ko * c3, c_dec),
        c_dec=c_dec, c_out=c_out, future_guided=future_guided,
    )


# ----------------------------------------------------------------------------
# Forward wrapper
# ----------------------------------------------------------------------------
def fdgt_forward(x, prep):
    """FDGT.forward.  x: (B, T+1, V, C) if future_guided else (B, T, V, C)."""
    B, n_frames, V, C = x.shape
    assert V == prep["V"] and C == prep["C"]
    assert n_frames == prep["T"] + (1 if prep["future_guided"] else 0)
    c_out = prep["c_out"]
    cols = n_frames * C

    # (B, t, V, C) -> per-batch node-major slab (V, t*C + c), cast to bf16 once.
    x_slab = jnp.transpose(x, (0, 2, 1, 3)).reshape(B, V, cols).astype(jnp.bfloat16)
    w_slab, b_slab, lk = prep["w_slab"], prep["b_slab"], prep["lk"]

    kernel = functools.partial(
        _fdgt_kernel,
        hist_cols=prep["hist_cols"], n_cheb=prep["Ks"],
        cheb_cols=prep["cheb_cols"], glu_halves=prep["glu_halves"],
        c_dec=prep["c_dec"], future_guided=prep["future_guided"],
        w_offs=prep["w_offs"], b_offs=prep["b_offs"])

    # Resident footprint (B-independent weights + double-buffered x block).
    resident = (int(w_slab.size) * 2 + int(lk.size) * 4 + int(b_slab.size) * 4
                + 2 * (V * cols * 2) + V * c_out * 4)
    vmem_limit = int(max(4 << 20, 4 * resident))

    out = pl.pallas_call(
        kernel,
        out_shape=jax.ShapeDtypeStruct((B, V, c_out), jnp.float32),
        grid=(B,),
        in_specs=[
            pl.BlockSpec((1, V, cols), lambda b: (b, 0, 0)),
            pl.BlockSpec(w_slab.shape, lambda b: (0, 0)),
            pl.BlockSpec(lk.shape, lambda b: (0, 0, 0)),
            pl.BlockSpec(b_slab.shape, lambda b: (0, 0)),
        ],
        out_specs=pl.BlockSpec((1, V, c_out), lambda b: (b, 0, 0)),
        compiler_params=pltpu.CompilerParams(
            dimension_semantics=("parallel",),
            vmem_limit_bytes=vmem_limit),
    )(x_slab, w_slab, lk, b_slab)
    return out.reshape(B, 1, V, c_out)


# ----------------------------------------------------------------------------
# Pure-JAX f32 reference of the same (reconstructed) forward, for validation.
# ----------------------------------------------------------------------------
def fdgt_reference(x, params, Lk, future_guided):
    def tconv_glu(h, wp, wq, bp, bq):
        taps = wp.shape[0]
        t_out = h.shape[1] - taps + 1
        p = sum(jnp.einsum("btvc,cd->btvd", h[:, k:k + t_out], wp[k])
                for k in range(taps)) + bp
        q = sum(jnp.einsum("btvc,cd->btvd", h[:, k:k + t_out], wq[k])
                for k in range(taps)) + bq
        return p * jax.nn.sigmoid(q)

    def cheb(h, w, b):
        acc = sum(jnp.einsum("vu,btuc,cd->btvd", Lk[k], h, w[k])
                  for k in range(w.shape[0]))
        return jax.nn.relu(acc + b)

    h = x[:, :-1] if future_guided else x
    h = tconv_glu(h, params["Wp_t1"], params["Wq_t1"], params["bp_t1"], params["bq_t1"])
    h = cheb(h, params["W_gc"], params["b_gc"])
    h = tconv_glu(h, params["Wp_t2"], params["Wq_t2"], params["bp_t2"], params["bq_t2"])
    h = tconv_glu(h, params["Wp_t3"], params["Wq_t3"], params["bp_t3"], params["bq_t3"])
    d = tconv_glu(h, params["Wp_dec"], params["Wq_dec"], params["bp_dec"], params["bq_dec"])
    out = jnp.einsum("btvc,cd->btvd", d, params["W_fc_h"])
    if future_guided:
        out = out + jnp.einsum("bvc,cd->bvd", x[:, -1], params["W_fc_f"])[:, None]
    return out + params["b_fc"]


# ----------------------------------------------------------------------------
# Deterministic graph / parameter construction
# ----------------------------------------------------------------------------
def cheb_basis(n_vertex, Ks):
    """Scaled-Laplacian Chebyshev basis of a ring graph -> (Ks, V, V), f32."""
    V = n_vertex
    idx = jnp.arange(V)
    adj = (jnp.zeros((V, V))
           .at[idx, (idx + 1) % V].set(1.0)
           .at[idx, (idx - 1) % V].set(1.0))
    deg = jnp.sum(adj, axis=1)
    d_inv_sqrt = 1.0 / jnp.sqrt(deg)
    lap = jnp.eye(V) - d_inv_sqrt[:, None] * adj * d_inv_sqrt[None, :]
    lmax = jnp.max(jnp.linalg.eigvalsh(lap))
    Lt = 2.0 * lap / lmax - jnp.eye(V)
    Ts = [jnp.eye(V), Lt]
    for _ in range(2, Ks):
        Ts.append(2.0 * Lt @ Ts[-1] - Ts[-2])
    return jnp.stack(Ts[:Ks], axis=0).astype(jnp.float32)


def init_params(key, Kt, Ks, Ko, C, blocks):
    c1, c2, c3 = blocks[1]
    c_dec = blocks[2][0]
    c_out = blocks[3][0]
    ks = jax.random.split(key, 11)

    def w(k, shape):
        fan_in = 1
        for s in shape[:-1]:
            fan_in *= s
        return (jax.random.normal(k, shape, jnp.float32)
                / jnp.sqrt(jnp.float32(fan_in)))

    z = lambda n: jnp.zeros((1, n), jnp.float32)
    return {
        "Wp_t1": w(ks[0], (Kt, C, c1)),  "Wq_t1": w(ks[1], (Kt, C, c1)),
        "bp_t1": z(c1), "bq_t1": z(c1),
        "W_gc":  w(ks[2], (Ks, c1, c2)), "b_gc":  z(c2),
        "Wp_t2": w(ks[3], (Kt, c2, c3)), "Wq_t2": w(ks[4], (Kt, c2, c3)),
        "bp_t2": z(c3), "bq_t2": z(c3),
        "Wp_t3": w(ks[5], (Kt, c3, c3)), "Wq_t3": w(ks[6], (Kt, c3, c3)),
        "bp_t3": z(c3), "bq_t3": z(c3),
        "Wp_dec": w(ks[7], (Ko, c3, c_dec)), "Wq_dec": w(ks[8], (Ko, c3, c_dec)),
        "bp_dec": z(c_dec), "bq_dec": z(c_dec),
        "W_fc_h": w(ks[9], (c_dec, c_out)),
        "W_fc_f": w(ks[10], (C, c_out)),
        "b_fc": z(c_out),
    }


# ----------------------------------------------------------------------------
if __name__ == "__main__":
    # Small deterministic config.
    B, C, T, V = 2, 2, 10, 8          # batch, n_feature, history length, n_vertex
    Kt, Ks = 3, 3                     # temporal kernel, Chebyshev order
    blocks = [[C], [16, 8, 16], [16], [1]]
    future_guided = True
    Ko = T - 3 * (Kt - 1)             # = 4, as in FDGT.__init__

    key = jax.random.PRNGKey(0)
    kx, kp = jax.random.split(key)
    # (B, T+1, V, C): T history frames + 1 future-guidance frame.
    x = jax.random.normal(kx, (B, T + 1, V, C), jnp.float32)

    params = init_params(kp, Kt, Ks, Ko, C, blocks)
    Lk = cheb_basis(V, Ks)
    prep = prepare_fdgt(params, Lk, T=T, C=C, Kt=Kt, Ks=Ks, Ko=Ko,
                        blocks=blocks, future_guided=future_guided)

    out = fdgt_forward(x, prep)
    jax.block_until_ready(out)
    assert out.shape == (B, 1, V, blocks[3][0])
    assert bool(jnp.all(jnp.isfinite(out)))

    ref = fdgt_reference(x, params, Lk, future_guided)
    err = float(jnp.max(jnp.abs(out - ref)))
    assert err < 0.25, f"kernel vs f32 reference: max|err| = {err}"
    print("KERNEL_OK")
</pallas_src>

<mosaic_0001>
module attributes {stable_mosaic.version = 11 : i64} {
  func.func @_fdgt_kernel(%arg0: i32, %arg1: memref<1x8x22xbf16, #tpu.memory_space<vmem>>, %arg2: memref<416x256xbf16, #tpu.memory_space<vmem>>, %arg3: memref<3x8x8xf32, #tpu.memory_space<vmem>>, %arg4: memref<1x673xf32, #tpu.memory_space<vmem>>, %arg5: memref<1x8x1xf32, #tpu.memory_space<vmem>>) attributes {dimension_semantics = [#tpu.dimension_semantics<parallel>], iteration_bounds = array<i64: 2>, scalar_prefetch = 0 : i64, scratch_operands = 0 : i64, tpu.core_type = #tpu.core_type<tc>, window_params = [{transform_indices = @transform_0, window_bounds = array<i64: 1, 8, 22>}, {pipeline_mode = #tpu.pipeline_mode<synchronous>, transform_indices = @transform_1, window_bounds = array<i64: 416, 256>}, {pipeline_mode = #tpu.pipeline_mode<synchronous>, transform_indices = @transform_2, window_bounds = array<i64: 3, 8, 8>}, {pipeline_mode = #tpu.pipeline_mode<synchronous>, transform_indices = @transform_3, window_bounds = array<i64: 1, 673>}, {transform_indices = @transform_4, window_bounds = array<i64: 1, 8, 1>}]} {
    %c0 = arith.constant 0 : index
    %c0_0 = arith.constant 0 : index
    %c0_1 = arith.constant 0 : index
    %0 = vector.load %arg1[%c0, %c0_0, %c0_1] : memref<1x8x22xbf16, #tpu.memory_space<vmem>>, vector<1x8x22xbf16>
    %1 = vector.shape_cast %0 : vector<1x8x22xbf16> to vector<8x22xbf16>
    %2 = vector.extract_strided_slice %1 {offsets = [0, 0], sizes = [8, 20], strides = [1, 1]} : vector<8x22xbf16> to vector<8x20xbf16>
    %c0_2 = arith.constant 0 : index
    %c0_3 = arith.constant 0 : index
    %3 = vector.load %arg2[%c0_2, %c0_3] : memref<416x256xbf16, #tpu.memory_space<vmem>>, vector<20x256xbf16>
    %cst = arith.constant dense<0.000000e+00> : vector<8x256xf32>
    %4 = tpu.matmul %2, %3, %cst {dimension_numbers = #tpu.dot_dimension_numbers<[1], [0], [0], [1], [0, 0, 1, 1], [], []>} : vector<8x20xbf16>, vector<20x256xbf16>, vector<8x256xf32> -> vector<8x256xf32>
    %c0_4 = arith.constant 0 : index
    %c0_5 = arith.constant 0 : index
    %5 = vector.load %arg4[%c0_4, %c0_5] : memref<1x673xf32, #tpu.memory_space<vmem>>, vector<1x256xf32>
    %6 = vector.broadcast %5 : vector<1x256xf32> to vector<8x256xf32>
    %7 = arith.addf %4, %6 : vector<8x256xf32>
    %8 = vector.extract_strided_slice %7 {offsets = [0, 0], sizes = [8, 128], strides = [1, 1]} : vector<8x256xf32> to vector<8x128xf32>
    %9 = vector.extract_strided_slice %7 {offsets = [0, 128], sizes = [8, 128], strides = [1, 1]} : vector<8x256xf32> to vector<8x128xf32>
    %10 = arith.negf %9 : vector<8x128xf32>
    %11 = math.exp %10 : vector<8x128xf32>
    %cst_6 = arith.constant 1.000000e+00 : f32
    %12 = vector.broadcast %cst_6 : f32 to vector<8x128xf32>
    %13 = arith.addf %12, %11 : vector<8x128xf32>
    %14 = arith.divf %12, %13 : vector<8x128xf32>
    %15 = arith.mulf %8, %14 : vector<8x128xf32>
    %16 = arith.truncf %15 : vector<8x128xf32> to vector<8x128xbf16>
    %c32 = arith.constant 32 : index
    %c0_7 = arith.constant 0 : index
    %17 = vector.load %arg2[%c32, %c0_7] : memref<416x256xbf16, #tpu.memory_space<vmem>>, vector<128x192xbf16>
    %cst_8 = arith.constant dense<0.000000e+00> : vector<8x192xf32>
    %18 = tpu.matmul %16, %17, %cst_8 {dimension_numbers = #tpu.dot_dimension_numbers<[1], [0], [0], [1], [0, 0, 1, 1], [], []>} : vector<8x128xbf16>, vector<128x192xbf16>, vector<8x192xf32> -> vector<8x192xf32>
    %c0_9 = arith.constant 0 : index
    %c0_10 = arith.constant 0 : index
    %c0_11 = arith.constant 0 : index
    %19 = vector.load %arg3[%c0_9, %c0_10, %c0_11] : memref<3x8x8xf32, #tpu.memory_space<vmem>>, vector<1x8x8xf32>
    %20 = vector.shape_cast %19 : vector<1x8x8xf32> to vector<8x8xf32>
    %21 = vector.extract_strided_slice %18 {offsets = [0, 0], sizes = [8, 64], strides = [1, 1]} : vector<8x192xf32> to vector<8x64xf32>
    %cst_12 = arith.constant dense<0.000000e+00> : vector<8x64xf32>
    %22 = tpu.matmul %20, %21, %cst_12 {dimension_numbers = #tpu.dot_dimension_numbers<[1], [0], [0], [1], [0, 0, 1, 1], [], []>} : vector<8x8xf32>, vector<8x64xf32>, vector<8x64xf32> -> vector<8x64xf32>
    %c1 = arith.constant 1 : index
    %c0_13 = arith.constant 0 : index
    %c0_14 = arith.constant 0 : index
    %23 = vector.load %arg3[%c1, %c0_13, %c0_14] : memref<3x8x8xf32, #tpu.memory_space<vmem>>, vector<1x8x8xf32>
    %24 = vector.shape_cast %23 : vector<1x8x8xf32> to vector<8x8xf32>
    %25 = vector.extract_strided_slice %18 {offsets = [0, 64], sizes = [8, 64], strides = [1, 1]} : vector<8x192xf32> to vector<8x64xf32>
    %cst_15 = arith.constant dense<0.000000e+00> : vector<8x64xf32>
    %26 = tpu.matmul %24, %25, %cst_15 {dimension_numbers = #tpu.dot_dimension_numbers<[1], [0], [0], [1], [0, 0, 1, 1], [], []>} : vector<8x8xf32>, vector<8x64xf32>, vector<8x64xf32> -> vector<8x64xf32>
    %27 = arith.addf %22, %26 : vector<8x64xf32>
    %c2 = arith.constant 2 : index
    %c0_16 = arith.constant 0 : index
    %c0_17 = arith.constant 0 : index
    %28 = vector.load %arg3[%c2, %c0_16, %c0_17] : memref<3x8x8xf32, #tpu.memory_space<vmem>>, vector<1x8x8xf32>
    %29 = vector.shape_cast %28 : vector<1x8x8xf32> to vector<8x8xf32>
    %30 = vector.extract_strided_slice %18 {offsets = [0, 128], sizes = [8, 64], strides = [1, 1]} : vector<8x192xf32> to vector<8x64xf32>
    %cst_18 = arith.constant dense<0.000000e+00> : vector<8x64xf32>
    %31 = tpu.matmul %29, %30, %cst_18 {dimension_numbers = #tpu.dot_dimension_numbers<[1], [0], [0], [1], [0, 0, 1, 1], [], []>} : vector<8x8xf32>, vector<8x64xf32>, vector<8x64xf32> -> vector<8x64xf32>
    %32 = arith.addf %27, %31 : vector<8x64xf32>
    %c0_19 = arith.constant 0 : index
    %c256 = arith.constant 256 : index
    %33 = vector.load %arg4[%c0_19, %c256] : memref<1x673xf32, #tpu.memory_space<vmem>>, vector<1x64xf32>
    %34 = vector.broadcast %33 : vector<1x64xf32> to vector<8x64xf32>
    %35 = arith.addf %32, %34 : vector<8x64xf32>
    %cst_20 = arith.constant 0.000000e+00 : f32
    %36 = vector.broadcast %cst_20 : f32 to vector<8x64xf32>
    %37 = arith.maximumf %35, %36 : vector<8x64xf32>
    %38 = arith.truncf %37 : vector<8x64xf32> to vector<8x64xbf16>
    %c160 = arith.constant 160 : index
    %c0_21 = arith.constant 0 : index
    %39 = vector.load %arg2[%c160, %c0_21] : memref<416x256xbf16, #tpu.memory_space<vmem>>, vector<64x192xbf16>
    %cst_22 = arith.constant dense<0.000000e+00> : vector<8x192xf32>
    %40 = tpu.matmul %38, %39, %cst_22 {dimension_numbers = #tpu.dot_dimension_numbers<[1], [0], [0], [1], [0, 0, 1, 1], [], []>} : vector<8x64xbf16>, vector<64x192xbf16>, vector<8x192xf32> -> vector<8x192xf32>
    %c0_23 = arith.constant 0 : index
    %c320 = arith.constant 320 : index
    %41 = vector.load %arg4[%c0_23, %c320] : memref<1x673xf32, #tpu.memory_space<vmem>>, vector<1x192xf32>
    %42 = vector.broadcast %41 : vector<1x192xf32> to vector<8x192xf32>
    %43 = arith.addf %40, %42 : vector<8x192xf32>
    %44 = vector.extract_strided_slice %43 {offsets = [0, 0], sizes = [8, 96], strides = [1, 1]} : vector<8x192xf32> to vector<8x96xf32>
    %45 = vector.extract_strided_slice %43 {offsets = [0, 96], sizes = [8, 96], strides = [1, 1]} : vector<8x192xf32> to vector<8x96xf32>
    %46 = arith.negf %45 : vector<8x96xf32>
    %47 = math.exp %46 : vector<8x96xf32>
    %cst_24 = arith.constant 1.000000e+00 : f32
    %48 = vector.broadcast %cst_24 : f32 to vector<8x96xf32>
    %49 = arith.addf %48, %47 : vector<8x96xf32>
    %50 = arith.divf %48, %49 : vector<8x96xf32>
    %51 = arith.mulf %44, %50 : vector<8x96xf32>
    %52 = arith.truncf %51 : vector<8x96xf32> to vector<8x96xbf16>
    %c224 = arith.constant 224 : index
    %c0_25 = arith.constant 0 : index
    %53 = vector.load %arg2[%c224, %c0_25] : memref<416x256xbf16, #tpu.memory_space<vmem>>, vector<96x128xbf16>
    %cst_26 = arith.constant dense<0.000000e+00> : vector<8x128xf32>
    %54 = tpu.matmul %52, %53, %cst_26 {dimension_numbers = #tpu.dot_dimension_numbers<[1], [0], [0], [1], [0, 0, 1, 1], [], []>} : vector<8x96xbf16>, vector<96x128xbf16>, vector<8x128xf32> -> vector<8x128xf32>
    %c0_27 = arith.constant 0 : index
    %c512 = arith.constant 512 : index
    %55 = vector.load %arg4[%c0_27, %c512] : memref<1x673xf32, #tpu.memory_space<vmem>>, vector<1x128xf32>
    %56 = vector.broadcast %55 : vector<1x128xf32> to vector<8x128xf32>
    %57 = arith.addf %54, %56 : vector<8x128xf32>
    %58 = vector.extract_strided_slice %57 {offsets = [0, 0], sizes = [8, 64], strides = [1, 1]} : vector<8x128xf32> to vector<8x64xf32>
    %59 = vector.extract_strided_slice %57 {offsets = [0, 64], sizes = [8, 64], strides = [1, 1]} : vector<8x128xf32> to vector<8x64xf32>
    %60 = arith.negf %59 : vector<8x64xf32>
    %61 = math.exp %60 : vector<8x64xf32>
    %cst_28 = arith.constant 1.000000e+00 : f32
    %62 = vector.broadcast %cst_28 : f32 to vector<8x64xf32>
    %63 = arith.addf %62, %61 : vector<8x64xf32>
    %64 = arith.divf %62, %63 : vector<8x64xf32>
    %65 = arith.mulf %58, %64 : vector<8x64xf32>
    %66 = arith.truncf %65 : vector<8x64xf32> to vector<8x64xbf16>
    %c320_29 = arith.constant 320 : index
    %c0_30 = arith.constant 0 : index
    %67 = vector.load %arg2[%c320_29, %c0_30] : memref<416x256xbf16, #tpu.memory_space<vmem>>, vector<64x32xbf16>
    %cst_31 = arith.constant dense<0.000000e+00> : vector<8x32xf32>
    %68 = tpu.matmul %66, %67, %cst_31 {dimension_numbers = #tpu.dot_dimension_numbers<[1], [0], [0], [1], [0, 0, 1, 1], [], []>} : vector<8x64xbf16>, vector<64x32xbf16>, vector<8x32xf32> -> vector<8x32xf32>
    %c0_32 = arith.constant 0 : index
    %c640 = arith.constant 640 : index
    %69 = vector.load %arg4[%c0_32, %c640] : memref<1x673xf32, #tpu.memory_space<vmem>>, vector<1x32xf32>
    %70 = vector.broadcast %69 : vector<1x32xf32> to vector<8x32xf32>
    %71 = arith.addf %68, %70 : vector<8x32xf32>
    %72 = vector.extract_strided_slice %71 {offsets = [0, 0], sizes = [8, 16], strides = [1, 1]} : vector<8x32xf32> to vector<8x16xf32>
    %73 = vector.extract_strided_slice %71 {offsets = [0, 16], sizes = [8, 16], strides = [1, 1]} : vector<8x32xf32> to vector<8x16xf32>
    %74 = arith.negf %73 : vector<8x16xf32>
    %75 = math.exp %74 : vector<8x16xf32>
    %cst_33 = arith.constant 1.000000e+00 : f32
    %76 = vector.broadcast %cst_33 : f32 to vector<8x16xf32>
    %77 = arith.addf %76, %75 : vector<8x16xf32>
    %78 = arith.divf %76, %77 : vector<8x16xf32>
    %79 = arith.mulf %72, %78 : vector<8x16xf32>
    %c384 = arith.constant 384 : index
    %c0_34 = arith.constant 0 : index
    %80 = vector.load %arg2[%c384, %c0_34] : memref<416x256xbf16, #tpu.memory_space<vmem>>, vector<18x1xbf16>
    %81 = arith.truncf %79 : vector<8x16xf32> to vector<8x16xbf16>
    %82 = vector.extract_strided_slice %80 {offsets = [0, 0], sizes = [16, 1], strides = [1, 1]} : vector<18x1xbf16> to vector<16x1xbf16>
    %cst_35 = arith.constant dense<0.000000e+00> : vector<8x1xf32>
    %83 = tpu.matmul %81, %82, %cst_35 {dimension_numbers = #tpu.dot_dimension_numbers<[1], [0], [0], [1], [0, 0, 1, 1], [], []>} : vector<8x16xbf16>, vector<16x1xbf16>, vector<8x1xf32> -> vector<8x1xf32>
    %84 = vector.extract_strided_slice %1 {offsets = [0, 20], sizes = [8, 2], strides = [1, 1]} : vector<8x22xbf16> to vector<8x2xbf16>
    %85 = vector.extract_strided_slice %80 {offsets = [16, 0], sizes = [2, 1], strides = [1, 1]} : vector<18x1xbf16> to vector<2x1xbf16>
    %cst_36 = arith.constant dense<0.000000e+00> : vector<8x1xf32>
    %86 = tpu.matmul %84, %85, %cst_36 {dimension_numbers = #tpu.dot_dimension_numbers<[1], [0], [0], [1], [0, 0, 1, 1], [], []>} : vector<8x2xbf16>, vector<2x1xbf16>, vector<8x1xf32> -> vector<8x1xf32>
    %87 = arith.addf %83, %86 : vector<8x1xf32>
    %c0_37 = arith.constant 0 : index
    %c672 = arith.constant 672 : index
    %88 = vector.load %arg4[%c0_37, %c672] : memref<1x673xf32, #tpu.memory_space<vmem>>, vector<1x1xf32>
    %89 = vector.broadcast %88 : vector<1x1xf32> to vector<8x1xf32>
    %90 = arith.addf %87, %89 : vector<8x1xf32>
    %91 = vector.shape_cast %90 : vector<8x1xf32> to vector<1x8x1xf32>
    %c0_38 = arith.constant 0 : index
    %c0_39 = arith.constant 0 : index
    %c0_40 = arith.constant 0 : index
    %92 = vector.load %arg5[%c0_38, %c0_39, %c0_40] : memref<1x8x1xf32, #tpu.memory_space<vmem>>, vector<1x8x1xf32>
    tpu.vector_store %arg5[%c0_38, %c0_39, %c0_40], %91 {strides = array<i32>} : memref<1x8x1xf32, #tpu.memory_space<vmem>>, vector<1x8x1xf32>,
    return
  }
  func.func @transform_0(%arg0: i32) -> (i32, i32, i32) {
    %c0_i32 = arith.constant 0 : i32
    %c0_i32_0 = arith.constant 0 : i32
    %c0_i32_1 = arith.constant 0 : i32
    return %arg0, %c0_i32, %c0_i32_0 : i32, i32, i32
  }
  func.func @transform_1(%arg0: i32) -> (i32, i32) {
    %c0_i32 = arith.constant 0 : i32
    %c0_i32_0 = arith.constant 0 : i32
    %c0_i32_1 = arith.constant 0 : i32
    return %c0_i32, %c0_i32_0 : i32, i32
  }
  func.func @transform_2(%arg0: i32) -> (i32, i32, i32) {
    %c0_i32 = arith.constant 0 : i32
    %c0_i32_0 = arith.constant 0 : i32
    %c0_i32_1 = arith.constant 0 : i32
    %c0_i32_2 = arith.constant 0 : i32
    return %c0_i32, %c0_i32_0, %c0_i32_1 : i32, i32, i32
  }
  func.func @transform_3(%arg0: i32) -> (i32, i32) {
    %c0_i32 = arith.constant 0 : i32
    %c0_i32_0 = arith.constant 0 : i32
    %c0_i32_1 = arith.constant 0 : i32
    return %c0_i32, %c0_i32_0 : i32, i32
  }
  func.func @transform_4(%arg0: i32) -> (i32, i32, i32) {
    %c0_i32 = arith.constant 0 : i32
    %c0_i32_0 = arith.constant 0 : i32
    %c0_i32_1 = arith.constant 0 : i32
    return %arg0, %c0_i32, %c0_i32_0 : i32, i32, i32
  }
}

</mosaic_0001>

<bundles_post_ra>
// kernel: tpu_custom_call.1
= control target key start
LH: loop header
LB: loop body
LE: loop exit
PB: predicated region body
PF: predicated region fallthrough
CT: control target
= control target key end

     0   :  { %9 = vsyncpa [#allocation3], 0  ;;  %s1943_s0 = inlined_call_operand.hbm [shape: bf16[2,8,22], index: 0, kind: input, shape index: {}]   ;;  %s1944_s1 = inlined_call_operand.hbm [shape: bf16[416,256], index: 1, kind: input, shape index: {}]   ;;  %s1945_s2 = inlined_call_operand.hbm [shape: f32[3,8,8], index: 2, kind: input, shape index: {}]   ;;  %s1946_s3 = inlined_call_operand.vmem [shape: f32[1,673], index: 3, kind: input, shape index: {}]   ;;  %s1947_s4 = inlined_call_operand.vmem [shape: f32[2,8,1], index: 4, kind: output, shape index: {}]  }
   0x1   :  { %11 = vsyncpa [#allocation3 + $0x1], 0 }
   0x2   :  { %12 = vsyncpa [#allocation5], 0  ;;  %s1701_s15 = smov 0   ;;  %s1703_s16 = smov 0  }
   0x3   :  { %s1705_s17 = smov 0   ;;  %s1707_s18 = smov 0  }
   0x4 LB: > { %s1720_s19 = sadd.s32 4294967295, %s1661_s18   ;;  %p38_p0 = scmp.ne.s32.totalorder %s1653_s16, %s1649_s15  ;;  %s1661_s18 = sphi %s1707_s18, %s1962_s18   ;;  %s1657_s17 = sphi %s1705_s17, %s1961_s17   ;;  %s1653_s16 = sphi %s1703_s16, %s1960_s16   ;;  %s1649_s15 = sphi %s1701_s15, %s1959_s15  }
   0x5   : > { %p1948_p1 = scmp.eq.s32.totalorder %s1720_s19, 0  ;;  %p1246_p2 = scmp.ge.s32.totalorder %s1661_s18, 1 }
   0x6   : > { %p138_p3 = scmp.lt.s32.totalorder %s1661_s18, 3  ;;  %s1663_s22 = smov [#allocation4]  }
   0x7   : > { %p1728_p4 = por %p1948_p1, %p38_p0  ;;  %s150_s23 = sshll.u32 %s1663_s22, 4  ;;  %s151_s23 = int_to_ptr.vmem [resolvable:$true] %s150_s23 }
   0x8   : > { %p1732_p5 = pnand %p1246_p2, %p138_p3  ;;  %s1664_s25 = smov [#allocation6]  }
   0x9   : > { %s1951_s20 = scalar_select %p1728_p4, 1, 0 }
   0xa   : > { %s1952_s21 = scalar_select %p1732_p5, 1, 0 }
   0xb   : > { %p1404_p6 = pneg %p1732_p5  ;;  %s163_s26 = sshll.u32 %s1664_s25, 4  ;;  %s1744_s26 = int_to_ptr.vmem [resolvable:$true] %s163_s26 }
   0xc   : > { %s1537_s29 = scalar_lea.hbm %s1944_s1, 6656 }
   0xd   : > { %p1740_p7 = pnand %p1404_p6, %p1948_p1  ;;  %p1538_p8 = scmp.ne.s32.totalorder %s1944_s1, %s1537_s29 }
   0xe   : > { %p1544_p12 = scmp.lt.u32.totalorder %s1537_s29, %s1944_s1 }
   0xf   : > { %p1539_p9 = pneg %p1740_p7 }
  0x11   : > { %p1540_p10 = pnand %p1539_p9, %p1538_p8 }
  0x13   : > { %p1541_p11 = pneg %p1540_p10 }
  0x15   : > { %p1546_p13 = pnand %p1544_p12, %p1541_p11 }
  0x17   : > { %1549 = shalt.err (!%p1546_p13)
}
  0x18   : > { %s1550_s8 = scalar_lea.vmem %s151_s23, 6656  ;;  %p1558_p6 = scmp.lt.s32.totalorder %s151_s23, %s151_s23 }
  0x19   : > { %p1551_p0 = scmp.ne.s32.totalorder %s151_s23, %s1550_s8  ;;  %p1559_p1 = scmp.lt.s32.totalorder %s1550_s8, %s1550_s8 }
  0x1b   : > { %p1553_p2 = pnand %p1551_p0, %p1539_p9  ;;  %p1560_p4 = por %p1559_p1, %p1558_p6 }
  0x1d   : > { %p1554_p3 = pneg %p1553_p2 }
  0x1f   : > { %p1561_p5 = pnand %p1560_p4, %p1554_p3 }
  0x21   : > { %1564 = shalt.err (!%p1561_p5)
}
  0x22   : > { %s1665_s9 = smov 128   ;;  %s1666_s10 = smov 8  }
  0x23   : > { %1407 = dma.hbm_to_vmem [thread:$0]  (!%p1740_p7), %s1944_s1, 6656, %s151_s23, [#allocation5], %s1665_s9, %s1665_s9, %s1666_s10  }
  0x24   : > { %s1565_s15 = scalar_lea.hbm %s1945_s2, 384 }
  0x25   : > { %p1566_p8 = scmp.ne.s32.totalorder %s1945_s2, %s1565_s15  ;;  %p1572_p5 = scmp.lt.u32.totalorder %s1565_s15, %s1945_s2 }
  0x27   : > { %p1568_p1 = pnand %p1566_p8, %p1539_p9 }
  0x29   : > { %p1569_p4 = pneg %p1568_p1 }
  0x2b   : > { %p1574_p10 = pnand %p1572_p5, %p1569_p4 }
  0x2d   : > { %1577 = shalt.err (!%p1574_p10)
}
  0x2e   : > { %s1578_s23 = scalar_lea.vmem %s1744_s26, 384  ;;  %p1586_p0 = scmp.lt.s32.totalorder %s1744_s26, %s1744_s26 }
  0x2f   : > { %p1579_p11 = scmp.ne.s32.totalorder %s1744_s26, %s1578_s23  ;;  %p1587_p2 = scmp.lt.s32.totalorder %s1578_s23, %s1578_s23 }
  0x31   : > { %p1581_p12 = pnand %p1579_p11, %p1539_p9  ;;  %p1588_p3 = por %p1587_p2, %p1586_p0 }
  0x33   : > { %p1582_p13 = pneg %p1581_p12 }
  0x35   : > { %p1589_p6 = pnand %p1588_p3, %p1582_p13 }
  0x37   : > { %1592 = shalt.err (!%p1589_p6)
}
  0x38   : > { %1410 = dma.hbm_to_vmem [thread:$0]  (!%p1740_p7), %s1945_s2, 384, %s1744_s26, [#allocation5], %s1665_s9, %s1665_s9, %s1666_s10  }
  0x39   : > { %s1794_s5 = sadd.s32 1, %s1661_s18   ;;  %s25_s6 = sadd.s32 1, %s1657_s17 }
  0x3a   : > { %s22_s24 = ssub.s32 %s1661_s18, %s1794_s5  ;;  %p32_p9 = scmp.ne.s32.totalorder %s1657_s17, %s1653_s16 }
  0x3b   : > { %p23_p8 = scmp.eq.s32.totalorder %s22_s24, 0  ;;  %p33_p1 = scmp.eq.s32.totalorder %s1661_s18, 0 }
  0x3c   : > { %p1417_p4 = scmp.lt.s32.totalorder %s1661_s18, 2  ;;  %s180_s7 = sand.u32 1, %s1657_s17  }
  0x3d   : > { %s1805_s8 = scalar_select %p23_p8, %s1657_s17, %s25_s6  }
  0x3e   : > { %p34_p5 = por %p33_p1, %p32_p9  ;;  %s1250_s11 = sshll.u32 %s180_s7, 2 }
  0x3f   : > { %s1251_s12 = sshll.u32 %s1661_s18, 6  ;;  %s184_s26 = scalar_lea.vmem [#allocation2], %s1250_s11 }
  0x40   : > { %s1811_s15 = scalar_lea.hbm %s1943_s0, %s1251_s12  ;;  %s191_s9 = sshll.u32 %s184_s26, 4  ;;  %s1817_s9 = int_to_ptr.vmem [resolvable:$true] %s191_s9 }
  0x41   : > { %p1813_p7 = pnand %p1417_p4, %p34_p5  ;;  %s181_s18 = scalar_lea.sflag [#allocation3], %s180_s7 }
  0x42   : > { %s1593_s22 = scalar_lea.hbm %s1811_s15, 64  ;;  %s1598_s28 = scalar_lea.hbm %s1943_s0, 128 }
  0x43   : > { %p1594_p10 = scmp.ne.s32.totalorder %s1811_s15, %s1593_s22  ;;  %p1595_p11 = pneg %p1813_p7 }
  0x44   : > { %p1599_p0 = scmp.lt.u32.totalorder %s1811_s15, %s1943_s0  ;;  %p1600_p2 = scmp.lt.u32.totalorder %s1598_s28, %s1593_s22 }
  0x45   : > { %p1596_p12 = pnand %p1595_p11, %p1594_p10  ;;  %p1602_p6 = scmp.lt.u32.totalorder %s1593_s22, %s1811_s15 }
  0x46   : > { %p1601_p3 = por %p1600_p2, %p1599_p0 }
  0x47   : > { %p1597_p13 = pneg %p1596_p12 }
  0x48   : > { %p1603_p9 = por %p1602_p6, %p1601_p3 }
  0x4a   : > { %p1604_p8 = pnand %p1603_p9, %p1597_p13 }
  0x4c   : > { %1607 = shalt.err (!%p1604_p8)
}
  0x4d   : > { %s1608_s30 = scalar_lea.vmem %s1817_s9, 64  ;;  %s1667_s6 = smov [#allocation2]  }
  0x4e   : > { %p1609_p1 = scmp.ne.s32.totalorder %s1817_s9, %s1608_s30  ;;  %s1613_s24 = sshll.u32 %s1667_s6, 4  ;;  %s1614_s24 = int_to_ptr.vmem [resolvable:$false] %s1613_s24 }
  0x4f   : > { %s1615_s7 = scalar_lea.vmem %s1614_s24, 128  ;;  %p1616_p10 = scmp.lt.s32.totalorder %s1817_s9, %s1614_s24 }
  0x50   : > { %p1611_p4 = pnand %p1609_p1, %p1595_p11  ;;  %p1617_p12 = scmp.lt.s32.totalorder %s1615_s7, %s1608_s30 }
  0x52   : > { %p1612_p5 = pneg %p1611_p4  ;;  %p1618_p0 = por %p1617_p12, %p1616_p10 }
  0x54   : > { %p1619_p2 = pnand %p1618_p0, %p1612_p5 }
  0x56   : > { %1622 = shalt.err (!%p1619_p2)
}
  0x57   : > { %1414 = dma.hbm_to_vmem [thread:$0]  (!%p1813_p7), %s1811_s15, 64, %s1817_s9, %s181_s18  }
  0x58   : > { %p1955_p13 = scmp.ne.s32.totalorder %s1952_s21, 0 }
  0x59   : > { %s202_s11 = sand.u32 (!%p1955_p13), 1, %s1653_s16   ;;  %p1956_p11 = scmp.ne.s32.totalorder (!%p1955_p13), %s1951_s20, 0 }
  0x5a   : > { %200 = sbr.rel (%p1955_p13) target bundleno = 2208 (0x8a0), region = 36  ;;  %s1253_s12 = sshll.u32 (!%p1955_p13), %s202_s11, 2 }
  0x5b   : > { %s203_s13 = scalar_lea.sflag (!%p1955_p13), [#allocation3], %s202_s11  ;;  %s206_s14 = scalar_lea.vmem (!%p1955_p13), [#allocation2], %s1253_s12 }
  0x61   : > { %1640 = dma.done.wait (%p1956_p11), %s203_s13, 64  }
  0x62   : > { %1642 = vsyncadd (%p1956_p11), %s203_s13, 4294967232  ;;  %p1957_p3 = scmp.eq.s32.totalorder %s1720_s19, 0 }
  0x64   : > { %1644 = dma.done.wait (%p1957_p3), [#allocation5], 7040   ;;  %p1958_p6 = pmov %p1957_p3 }
  0x65   : > { %v1668_v0 = vmov 0   ;;  %v1464_v1 = vld [vmem:[#allocation4 + $0x4] ss:$8 sps:$4 sm:$0xff]   ;;  %v1466_v2 = vld [vmem:[#allocation4] ss:$8 sps:$4 sm:$0xff]   ;;  %vm278_vm0 = vcmask 1041408   ;;  %v249_v24 = vlaneseq }
  0x66   : > { %1646 = vsyncadd (%p1958_p6), [#allocation5], 4294960256  ;;  %317 = vmatprep.mubr.bf16.mxu0 %v1668_v0  ;;  %462 = vmatprep.mubr.bf16.mxu1 %v1668_v0  ;;  %v246_v3 = vld [vmem:[#allocation4 + $0x10] sm:$0x33]  ;;  %v1857_v7 = vld [vmem:[%s206_s14] sm:$0xf] }
  0x67   : > { %285 = vmatprep.subr.bf16.mxu0 %v1464_v1  ;;  %v1260_v4 = vcombine.high %v246_v3, %v246_v3  ;;  %v1259_v5 = vcombine.low %v246_v3, %v246_v3  ;;  %vm274_vm1 = vcmask 162816   ;;  %v1469_v8 = vld [vmem:[#allocation4 + $0x24] ss:$8 sps:$4 sm:$0xff]   ;;  %v1471_v9 = vld [vmem:[#allocation4 + $0x20] ss:$8 sps:$4 sm:$0xff]   ;;  %v1860_v25 = vshrl.u32 %v249_v24, 7 }
  0x68   : > { %286 = vmatpush1.bf16.msra.mxu0 %v1466_v2  ;;  %430 = vmatprep.subr.bf16.mxu1 %v1469_v8  ;;  %v1472_v10 = vld [vmem:[#allocation4 + $0x34] ss:$8 sps:$4 sm:$0xff]   ;;  %v1474_v11 = vld [vmem:[#allocation4 + $0x30] ss:$8 sps:$4 sm:$0xff]   ;;  %v1475_v12 = vld [vmem:[#allocation4 + $0x44] ss:$8 sps:$4 sm:$0xff]  }
  0x69   : > { %1261 = vmatprep.subr.msk.bf16.mxu0 %vm278_vm0, %v1260_v4  ;;  %v280_v6 = vsel %vm278_vm0, %v1259_v5, 0  ;;  %431 = vmatpush1.bf16.msra.mxu1 %v1471_v9  ;;  %v1477_v13 = vld [vmem:[#allocation4 + $0x40] ss:$8 sps:$4 sm:$0xff]   ;;  %v1478_v14 = vld [vmem:[#allocation4 + $0x54] ss:$8 sps:$4 sm:$0xff]   ;;  %v255_v26 = vsub.s32 1, %v1860_v25 }
  0x6a   : > { %432 = vmatprep.subr.bf16.mxu1 %v1472_v10  ;;  %v1480_v15 = vld [vmem:[#allocation4 + $0x50] ss:$8 sps:$4 sm:$0xff]   ;;  %v1481_v16 = vld [vmem:[#allocation4 + $0x64] ss:$8 sps:$4 sm:$0xff]   ;;  %v1483_v17 = vld [vmem:[#allocation4 + $0x60] ss:$8 sps:$4 sm:$0xff]  }
  0x6b   : > { %v1484_v18 = vld [vmem:[#allocation4 + $0x74] ss:$8 sps:$4 sm:$0xff]   ;;  %v1486_v19 = vld [vmem:[#allocation4 + $0x70] ss:$8 sps:$4 sm:$0xff]   ;;  %v1487_v20 = vld [vmem:[#allocation4 + $0x84] ss:$8 sps:$4 sm:$0xff]  }
  0x6c   : > { %288 = vmatpush1.bf16.msra.mxu0 %v280_v6  ;;  %v1489_v21 = vld [vmem:[#allocation4 + $0x80] ss:$8 sps:$4 sm:$0xff]   ;;  %v1490_v22 = vld [vmem:[#allocation4 + $0x94] ss:$8 sps:$4 sm:$0xff]   ;;  %v1492_v23 = vld [vmem:[#allocation4 + $0x90] ss:$8 sps:$4 sm:$0xff]  }
  0x6d   : > { %433 = vmatpush1.bf16.msra.mxu1 %v1474_v11  ;;  %v247_v27 = vld [vmem:[%s1946_s3] sm:$0x3]  ;;  %v251_v37 = vsub.s32 0, %v1860_v25  ;;  %v1669_v43 = vmov 0.0   ;;  %vm1670_vm2 = vmmov 0   ;;  %s1671_s15 = smov 64  }
  0x6e   : > { %434 = vmatprep.subr.bf16.mxu1 %v1475_v12  ;;  %v256_v28 = vrot.slane %v247_v27, %v255_v26  ;;  %1339 = vmatprep.subr.mxu0 %v1669_v43  ;;  %v473_v48 = vld [vmem:[#allocation6 + $0x8] sm:$0xff]  ;;  %vm478_vm3 = vcmask 64512   ;;  %v471_v50 = vld [vmem:[#allocation6] sm:$0xff]  ;;  %v626_v52 = vld [vmem:[#allocation6 + $0x10] sm:$0xff]  ;;  %vm773_vm4 = vcmask 523264   ;;  %s1672_s22 = smov 32  }
  0x6f   : > { %1262 = vmatmul.mubr.msk.bf16.vlgmr.msra.gmra.mrb[0].mxu0 %vm274_vm1, %v1857_v7  ;;  %v252_v38 = vrot.slane %v247_v27, %v251_v37  ;;  %v1495_v51 = vld [vmem:[#allocation4 + $0xa4] ss:$8 sps:$4 sm:$0xff]   ;;  %v1493_v53 = vld [vmem:[#allocation4 + $0xa0] ss:$8 sps:$4 sm:$0xff]   ;;  %v1496_v54 = vld [vmem:[#allocation4 + $0xb0] ss:$8 sps:$4 sm:$0xff]  }
  0x70   : > { %1341 = vmatprep.mubr.msk.f32.mxu0 %vm1670_vm2, %v1669_v43  ;;  %v1498_v55 = vld [vmem:[#allocation4 + $0xb4] ss:$8 sps:$4 sm:$0xff]   ;;  %v1501_v56 = vld [vmem:[#allocation4 + $0xc4] ss:$8 sps:$4 sm:$0xff]   ;;  %v1499_v57 = vld [vmem:[#allocation4 + $0xc0] ss:$8 sps:$4 sm:$0xff]  }
  0x71   : > { %435 = vmatpush1.bf16.msra.mxu1 %v1477_v13  ;;  %v1504_v58 = vld [vmem:[#allocation4 + $0xd4] ss:$8 sps:$4 sm:$0xff]   ;;  %v1502_v59 = vld [vmem:[#allocation4 + $0xd0] ss:$8 sps:$4 sm:$0xff]   ;;  %v719_v60 = vld [vmem:[%s1946_s3 + $0x2] sm:$0x3] }
  0x72   : > { %436 = vmatprep.subr.bf16.mxu1 %v1478_v14  ;;  %v728_v61 = vrot.slane %v719_v60, %v255_v26  ;;  %v724_v62 = vrot.slane %v719_v60, %v251_v37  ;;  %v1283_v5 = vld [vmem:[%s1946_s3 + $0x2] ss:$0 sm:$0xff]  ;;  %v1506_v13 = vld [vmem:[#allocation4 + $0xf0] ss:$8 sps:$4 sm:$0xff]   ;;  %vm839_vm5 = vcmask 261120   ;;  %vm899_vm6 = vcmask 785408  }
  0x73   : > { %v1505_v12 = vld [vmem:[#allocation4 + $0xe0] ss:$8 sps:$4 sm:$0xff]   ;;  %s1673_s28 = smov 108   ;;  %vm1061_vm7 = vcmask 1040384   ;;  %vm1057_vm8 = vcmask 15360   ;;  %s1674_s30 = smov 112  }
  0x74   : > { %771 = vrot.lane.b32.xlu1 %v728_v61, %s1671_s15  ;;  %v1507_v14 = vld [vmem:[#allocation4 + $0x100] ss:$8 sps:$4 sm:$0xff]   ;;  %s1675_s6 = smov 96   ;;  %vm1111_vm9 = vcmask 130048   ;;  %p238_p7 = scmp.lt.s32.totalorder %s1720_s19, 1  ;;  %vm1159_vm10 = vcmask 7168  }
  0x75   : > { %437 = vmatpush1.bf16.msra.mxu1 %v1480_v15  ;;  %v1508_v15 = vld [vmem:[#allocation4 + $0x110] ss:$8 sps:$4 sm:$0xff]  }
  0x76   : > { %438 = vmatprep.subr.bf16.mxu1 %v1481_v16  ;;  %v1509_v16 = vld [vmem:[#allocation4 + $0x120] ss:$8 sps:$4 sm:$0xff]   ;;  %s1964_s19 = smov (!%p238_p7, %s1720_s19), 1 }
  0x77   : > { %s1256_s24 = sshll.u32 %s1964_s19, 3 }
  0x78   : > { %s241_s12 = scalar_lea.vmem %s1947_s4, %s1256_s24 }
  0x79   : > { %439 = vmatpush1.bf16.msra.mxu1 %v1483_v17 }
  0x7a   : > { %440 = vmatprep.subr.bf16.mxu1 %v1484_v18 }
  0x7d   : > { %441 = vmatpush1.bf16.msra.mxu1 %v1486_v19 }
  0x7e   : > { %442 = vmatprep.subr.bf16.mxu1 %v1487_v20 }
  0x81   : > { %443 = vmatpush1.bf16.msra.mxu1 %v1489_v21 }
  0x82   : > { %444 = vmatprep.subr.bf16.mxu1 %v1490_v22 }
  0x85   : > { %445 = vmatpush1.bf16.msra.mxu1 %v1492_v23 }
  0x86   : > { %1354 = vmatprep.subr.bf16.mxu1 %v1669_v43 }
  0xe6   : > { %v772_v17 = vpop.permute.xlu1 %771 }
 0x142   : > { %v319_v29 = vpop.f32.mrb[0].mxu0 }
 0x143   : > { %v321_v30 = vpop.f32.mrb[1].mxu0  ;;  %v320_v39 = vadd.f32 %v319_v29, %v252_v38 }
 0x144   : > { %v322_v31 = vadd.f32 %v321_v30, %v256_v28  ;;  %v323_v32 = vpop.f32.mrb[2].mxu0 }
 0x145   : > { %v324_v33 = vpop.f32.mrb[3].mxu0  ;;  %v1510_v32 = vld [vmem:[#allocation4 + $0x130] ss:$8 sps:$4 sm:$0xff]  }
 0x146   : > { %v1263_v34 = vmul.f32 -1.442695, %v322_v31 }
 0x148   : > { %1517 = vpow2.f32 %v1263_v34 }
 0x152   : > { %v1518_v35 = vpop.eup %1517 }
 0x153   : > { %v329_v36 = vadd.f32 1.0, %v1518_v35 }
 0x155   : > { %1519 = vrcp.f32 %v329_v36 }
 0x15f   : > { %v1520_v40 = vpop.eup %1519 }
 0x160   : > { %v332_v41 = vmul.f32 %v1520_v40, %v320_v39  ;;  %v1511_v40 = vld [vmem:[#allocation4 + $0x140] ss:$8 sps:$4 sm:$0xff]  }
 0x162   : > { %v333_v42 = vpack.c.bf16 %v332_v41, %v332_v41  ;;  %v1512_v41 = vld [vmem:[#allocation4 + $0x150] ss:$8 sps:$4 sm:$0xff]  }
 0x164   : > { %463 = vmatmul.mubr.bf16.vlgmr.msra.gmra.mrb[0].mxu1 %v333_v42  ;;  %v1513_v42 = vld [vmem:[#allocation4 + $0x160] ss:$8 sps:$4 sm:$0xff]  }
 0x165   : > { %1366 = vmatprep.mubr.msk.bf16.mxu1 %vm1670_vm2, %v1669_v43  ;;  %1355 = vmatpush3.bf16.msra.mxu1 %v1505_v12 }
 0x166   : > { %1356 = vmatprep.subr.bf16.mxu1 %v1669_v43 }
 0x169   : > { %1357 = vmatpush3.bf16.msra.mxu1 %v1506_v13 }
 0x16a   : > { %1358 = vmatprep.subr.bf16.mxu1 %v1669_v43 }
 0x16d   : > { %1359 = vmatpush3.bf16.msra.mxu1 %v1507_v14 }
 0x16e   : > { %1360 = vmatprep.subr.bf16.mxu1 %v1669_v43 }
 0x171   : > { %1361 = vmatpush3.bf16.msra.mxu1 %v1508_v15 }
 0x172   : > { %1362 = vmatprep.subr.bf16.mxu1 %v1669_v43 }
 0x175   : > { %1363 = vmatpush3.bf16.msra.mxu1 %v1509_v16 }
 0x176   : > { %1364 = vmatprep.subr.bf16.mxu1 %v1669_v43 }
 0x179   : > { %1365 = vmatpush3.bf16.msra.mxu1 %v1510_v32 }
 0x17a   : > { %1388 = vmatprep.subr.bf16.mxu1 %v1669_v43 }
 0x237   : > { %v464_v44 = vpop.f32.mrb[0].mxu1 }
 0x238   : > { %475 = vrot.lane.b32.xlu0 %v464_v44, %s1671_s15  ;;  %v466_v45 = vpop.f32.mrb[1].mxu1 }
 0x239   : > { %v468_v46 = vpop.f32.mrb[2].mxu1 }
 0x23a   : > { %v469_v47 = vpop.f32.mrb[3].mxu1 }
 0x23c   : > { %769 = vrot.lane.b32.xlu0 %v724_v62, %s1671_s15 }
 0x2aa   : > { %v476_v49 = vpop.permute.xlu0 %475 }
 0x2ab   : > { %1340 = vmatpush3.msra.mxu0 %v476_v49 }
 0x2ac   : > { %1342 = vmatmul.mubr.msk.f32.vlgmr.msra.gmra.mrb[4].mxu0 %vm478_vm3, %v473_v48  ;;  %1344 = vmatprep.subr.mxu0 %v1669_v43 }
 0x2ad   : > { %1345 = vmatpush3.msra.mxu0 %v464_v44  ;;  %1346 = vmatprep.mubr.msk.f32.mxu0 %vm1670_vm2, %v1669_v43  ;;  %v1295_v44 = vld [vmem:[%s1946_s3 + $0x4] ss:$0 sm:$0xff] }
 0x2ae   : > { %1349 = vmatprep.subr.mxu0 %v1669_v43  ;;  %v770_v18 = vpop.permute.xlu0 %769 }
 0x2af   : > { %v774_v19 = vsel %vm773_vm4, %v770_v18, %v772_v17 }
 0x2b0   : > { %1347 = vmatmul.mubr.msk.f32.vlgmr.msra.gmra.mrb[6].mxu0 %vm478_vm3, %v471_v50 }
 0x2b1   : > { %1350 = vmatpush3.msra.mxu0 %v466_v45  ;;  %1351 = vmatprep.mubr.msk.f32.mxu0 %vm1670_vm2, %v1669_v43 }
 0x2b2   : > { %780 = vmatprep.subr.bf16.mxu0 %v1495_v51 }
 0x2b4   : > { %1352 = vmatmul.mubr.msk.f32.vlgmr.msra.gmra.mrb[8].mxu0 %vm478_vm3, %v626_v52 }
 0x2b5   : > { %781 = vmatpush1.bf16.msra.mxu0 %v1493_v53  ;;  %812 = vmatprep.mubr.bf16.mxu0 %v1668_v0  ;;  %v1514_v53 = vld [vmem:[#allocation4 + $0x170] ss:$8 sps:$4 sm:$0xff]  }
 0x2b6   : > { %782 = vmatprep.subr.bf16.mxu0 %v1498_v55 }
 0x2b9   : > { %783 = vmatpush1.bf16.msra.mxu0 %v1496_v54 }
 0x2ba   : > { %784 = vmatprep.subr.bf16.mxu0 %v1501_v56 }
 0x2bd   : > { %785 = vmatpush1.bf16.msra.mxu0 %v1499_v57 }
 0x2be   : > { %786 = vmatprep.subr.bf16.mxu0 %v1504_v58  ;;  %v1311_v58 = vcombine.low %v1857_v7, %v1857_v7  ;;  %v1516_v7 = vld [vmem:[#allocation4 + $0x180] ss:$8 sps:$4 sm:$0xff]  }
 0x2c1   : > { %787 = vmatpush1.bf16.msra.mxu0 %v1502_v59  ;;  %v1304_v59 = vld [vmem:[%s1946_s3 + $0x5] ss:$0 sm:$0xff] }
 0x2c2   : > { %1370 = vmatprep.subr.bf16.mxu0 %v1669_v43 }
 0x37f   : > { %v548_v63 = vpop.f32.mrb[4].mxu0 }
 0x380   : > { %v1343_v0 = vpop.f32.mrb[5].mxu0 }
 0x383   : > { %v621_v1 = vpop.f32.mrb[6].mxu0 }
 0x384   : > { %v622_v2 = vadd.f32 %v621_v1, %v548_v63  ;;  %v1348_v3 = vpop.f32.mrb[7].mxu0 }
 0x387   : > { %v696_v4 = vpop.f32.mrb[8].mxu0 }
 0x388   : > { %v700_v6 = vadd.f32 %v696_v4, %v622_v2  ;;  %v1353_v8 = vpop.f32.mrb[9].mxu0  ;;  %v1050_v2 = vld [vmem:[#allocation4 + $0x190] sm:$0x1] }
 0x389   : > { %v1063_v3 = vsel %vm1061_vm7, %v1050_v2, 0 }
 0x38a   : > { %v708_v9 = vadd.f32 %v1283_v5, %v700_v6 }
 0x38c   : > { %v709_v10 = vmax.f32 %v708_v9, 0.0 }
 0x38e   : > { %v710_v11 = vpack.c.bf16 %v709_v10, %v709_v10 }
 0x390   : > { %1292 = vmatmul.mubr.msk.bf16.vlgmr.msra.gmra.mrb[12].mxu0 %vm773_vm4, %v710_v11 }
 0x391   : > { %1378 = vmatprep.mubr.msk.bf16.mxu0 %vm1670_vm2, %v1669_v43  ;;  %1371 = vmatpush3.bf16.msra.mxu0 %v1511_v40 }
 0x392   : > { %1372 = vmatprep.subr.bf16.mxu0 %v1669_v43 }
 0x395   : > { %1373 = vmatpush3.bf16.msra.mxu0 %v1512_v41 }
 0x396   : > { %1374 = vmatprep.subr.bf16.mxu0 %v1669_v43 }
 0x399   : > { %1375 = vmatpush3.bf16.msra.mxu0 %v1513_v42 }
 0x39a   : > { %1376 = vmatprep.subr.bf16.mxu0 %v1669_v43 }
 0x39d   : > { %1377 = vmatpush3.bf16.msra.mxu0 %v1514_v53 }
 0x39e   : > { %1382 = vmatprep.subr.bf16.mxu0 %v1669_v43 }
 0x463   : > { %v814_v20 = vpop.f32.mrb[12].mxu0 }
 0x464   : > { %v815_v21 = vadd.f32 %v814_v20, %v774_v19  ;;  %v816_v22 = vpop.f32.mrb[13].mxu0 }
 0x465   : > { %v817_v23 = vadd.f32 %v816_v22, %v772_v17  ;;  %v818_v24 = vpop.f32.mrb[14].mxu0 }
 0x466   : > { %v1293_v25 = vmul.f32 -1.442695, %v815_v21  ;;  %v819_v26 = vpop.f32.mrb[15].mxu0 }
 0x467   : > { %v1294_v27 = vmul.f32 -1.442695, %v817_v23 }
 0x468   : > { %1521 = vpow2.f32 %v1293_v25 }
 0x469   : > { %1523 = vpow2.f32 %v1294_v27 }
 0x472   : > { %v1522_v28 = vpop.eup %1521 }
 0x473   : > { %v1524_v29 = vpop.eup %1523  ;;  %v827_v30 = vadd.f32 1.0, %v1522_v28 }
 0x474   : > { %v828_v31 = vadd.f32 1.0, %v1524_v29 }
 0x475   : > { %1525 = vrcp.f32 %v827_v30 }
 0x476   : > { %1527 = vrcp.f32 %v828_v31 }
 0x47f   : > { %v1526_v33 = vpop.eup %1525 }
 0x480   : > { %v1528_v34 = vpop.eup %1527  ;;  %835 = vrot.lane.b32.xlu1 %v1526_v33, %s1672_s22 }
 0x481   : > { %837 = vrot.lane.b32.xlu0 %v1528_v34, %s1672_s22 }
 0x4f2   : > { %v836_v35 = vpop.permute.xlu1 %835 }
 0x4f3   : > { %v838_v36 = vpop.permute.xlu0 %837 }
 0x4f4   : > { %v840_v37 = vsel %vm839_vm5, %v836_v35, %v838_v36 }
 0x4f5   : > { %v842_v38 = vmul.f32 %v840_v37, %v815_v21 }
 0x4f7   : > { %v843_v39 = vpack.c.bf16 %v842_v38, %v842_v38 }
 0x4f9   : > { %1367 = vmatmul.mubr.msk.bf16.vlgmr.msra.gmra.mrb[4].mxu1 %vm899_vm6, %v843_v39 }
 0x4fa   : > { %1390 = vmatprep.mubr.msk.bf16.mxu1 %vm1670_vm2, %v1669_v43  ;;  %1389 = vmatpush3.bf16.msra.mxu1 %v1516_v7 }
 0x5cc   : > { %v937_v45 = vpop.f32.mrb[4].mxu1 }
 0x5cd   : > { %v938_v46 = vadd.f32 %v1295_v44, %v937_v45  ;;  %v1368_v47 = vpop.f32.mrb[5].mxu1 }
 0x5ce   : > { %v940_v48 = vpop.f32.mrb[6].mxu1 }
 0x5cf   : > { %v1303_v49 = vmul.f32 -1.442695, %v938_v46  ;;  %v1369_v50 = vpop.f32.mrb[7].mxu1 }
 0x5d1   : > { %1529 = vpow2.f32 %v1303_v49 }
 0x5db   : > { %v1530_v51 = vpop.eup %1529 }
 0x5dc   : > { %v946_v52 = vadd.f32 1.0, %v1530_v51 }
 0x5de   : > { %1531 = vrcp.f32 %v946_v52 }
 0x5e8   : > { %v1532_v54 = vpop.eup %1531 }
 0x5e9   : > { %950 = vrot.lane.b32.xlu1 %v1532_v54, %s1671_s15 }
 0x5ed   : > { %1055 = vrot.lane.b32.xlu1 %v1311_v58, %s1673_s28 }
 0x65b   : > { %v951_v55 = vpop.permute.xlu1 %950 }
 0x65c   : > { %v953_v56 = vmul.f32 %v951_v55, %v938_v46 }
 0x65e   : > { %v954_v57 = vpack.c.bf16 %v953_v56, %v953_v56 }
 0x65f   : > { %v1056_v5 = vpop.permute.xlu1 %1055 }
 0x660   : > { %1379 = vmatmul.mubr.msk.bf16.vlgmr.msra.gmra.mrb[16].mxu0 %vm773_vm4, %v954_v57 }
 0x661   : > { %1384 = vmatprep.mubr.msk.bf16.mxu0 %vm1670_vm2, %v1669_v43  ;;  %1383 = vmatpush3.bf16.msra.mxu0 %v1063_v3 }
 0x668   : > { %1385 = vmatmul.mubr.msk.bf16.vlgmr.msra.gmra.mrb[20].mxu0 %vm1057_vm8, %v1056_v5 }
 0x733   : > { %v1031_v60 = vpop.f32.mrb[16].mxu0 }
 0x734   : > { %v1032_v61 = vadd.f32 %v1304_v59, %v1031_v60  ;;  %v1380_v62 = vpop.f32.mrb[17].mxu0 }
 0x735   : > { %v1034_v63 = vpop.f32.mrb[18].mxu0 }
 0x736   : > { %v1310_v0 = vmul.f32 -1.442695, %v1032_v61  ;;  %v1381_v1 = vpop.f32.mrb[19].mxu0 }
 0x738   : > { %1533 = vpow2.f32 %v1310_v0 }
 0x73b   : > { %v1099_v11 = vpop.f32.mrb[20].mxu0 }
 0x73c   : > { %v1386_v12 = vpop.f32.mrb[21].mxu0 }
 0x73d   : > { %v1102_v13 = vpop.f32.mrb[22].mxu0 }
 0x73e   : > { %v1387_v14 = vpop.f32.mrb[23].mxu0 }
 0x742   : > { %v1534_v43 = vpop.eup %1533 }
 0x743   : > { %v1040_v4 = vadd.f32 1.0, %v1534_v43 }
 0x745   : > { %1535 = vrcp.f32 %v1040_v4 }
 0x74f   : > { %v1536_v6 = vpop.eup %1535 }
 0x750   : > { %1044 = vrot.lane.b32.xlu0 %v1536_v6, %s1674_s30 }
 0x754   : > { %1155 = vrot.lane.b32.xlu0 %v1304_v59, %s1675_s6 }
 0x7c2   : > { %v1045_v8 = vpop.permute.xlu0 %1044 }
 0x7c3   : > { %v1047_v9 = vmul.f32 %v1045_v8, %v1032_v61 }
 0x7c5   : > { %v1051_v10 = vpack.c.bf16 %v1047_v9, %v1047_v9 }
 0x7c6   : > { %v1156_v16 = vpop.permute.xlu0 %1155 }
 0x7c7   : > { %1391 = vmatmul.mubr.msk.bf16.vlgmr.msra.gmra.mrb[8].mxu1 %vm1111_vm9, %v1051_v10 }
 0x89a   : > { %v1149_v15 = vpop.f32.mrb[8].mxu1 }
 0x89b   : > { %v1150_v17 = vadd.f32 %v1149_v15, %v1099_v11  ;;  %v1392_v18 = vpop.f32.mrb[9].mxu1 }
 0x89c   : > { %v1152_v19 = vpop.f32.mrb[10].mxu1 }
 0x89d   : > { %v1158_v20 = vadd.f32 %v1156_v16, %v1150_v17  ;;  %v1393_v21 = vpop.f32.mrb[11].mxu1 }
 0x89f   : > { %1160 = vst.msk [vmem:[%s241_s12] sm:$0xff] %vm1159_vm10, %v1158_v20 }
 0x8a0 PF: > { %p15_p9 = scmp.ge.s32.totalorder %s1794_s5, 4   ;;  %s1959_s15 = smov %s1653_s16 }
 0x8a1   : > { %s1960_s16 = smov %s1657_s17  ;;  %s1961_s17 = smov %s1805_s8 }
 0x8a2   : > { %s1962_s18 = smov %s1794_s5  ;;  %17 = sbr.rel (!%p15_p9) target bundleno = 4 (0x4), region = 86 }
 0x8a9   :  { %1180 = vsyncpa [#allocation3], 1 }
 0x8aa   :  { %1182 = vsyncpa [#allocation3 + $0x1], 1 }
 0x8ab   :  { %1183 = vsyncpa [#allocation5], 1 }

</bundles_post_ra>
